<compile_context>
chip_gen: v7x
topology: tpu7x:2x2x1
jax: 0.10.0
libtpu: 0.0.40
codegen_flags: <defaults>
</compile_context>

<pallas_src>
import math

import jax
import jax.numpy as jnp
from jax import lax
from jax.experimental import pallas as pl
from jax.experimental.pallas import tpu as pltpu


def _gelu_kernel(x_ref, o_ref):
    # Exact (erf-based) GELU, matching torch.nn.GELU() default:
    #   gelu(x) = 0.5 * x * (1 + erf(x / sqrt(2)))
    xf = x_ref[...].astype(jnp.float32)
    y = 0.5 * xf * (1.0 + lax.erf(xf * 0.7071067811865476))
    o_ref[...] = y.astype(o_ref.dtype)


_LANE_CANDIDATES = (2048, 1024, 512, 256, 128)  # wide, lane-dense last dim
_SUB = 8
_TARGET_BLOCK_BYTES = 2 * 1024 * 1024  # ~2 MiB/block: saturating, VMEM-safe


def _run_gelu_2d(x2d):
    rows, lane = x2d.shape
    itemsize = x2d.dtype.itemsize

    # Largest row-block keeping each block ~2 MiB.
    block_rows = min(rows, max(1, _TARGET_BLOCK_BYTES // (lane * itemsize)))
    if block_rows != rows:
        # Must be a multiple of the sublane tile (8) unless it spans all rows.
        block_rows = max(_SUB, (block_rows // _SUB) * _SUB)

    grid = (pl.cdiv(rows, block_rows),)  # ragged last block: OOB writes masked

    total = rows * lane
    cost = pl.CostEstimate(
        flops=6 * total,
        transcendentals=total,            # one erf per element
        bytes_accessed=2 * total * itemsize,
    )

    return pl.pallas_call(
        _gelu_kernel,
        out_shape=jax.ShapeDtypeStruct((rows, lane), x2d.dtype),
        grid_spec=pltpu.PrefetchScalarGridSpec(
            num_scalar_prefetch=0,
            grid=grid,
            in_specs=[pl.BlockSpec((block_rows, lane), lambda i: (i, 0))],
            out_specs=pl.BlockSpec((block_rows, lane), lambda i: (i, 0)),
        ),
        compiler_params=pltpu.CompilerParams(
            dimension_semantics=("parallel",),   # shard grid steps across TCs
            vmem_limit_bytes=32 * 1024 * 1024,   # headroom for 4x 2 MiB buffers
        ),
        cost_estimate=cost,
    )(x2d)


def gelu_pallas(x):
    orig_shape = x.shape
    total = math.prod(orig_shape)

    # Fast path: widest lane count dividing the element count → free reshape.
    lane = next((c for c in _LANE_CANDIDATES if total % c == 0), None)
    if lane is not None:
        x2d = jnp.reshape(x, (total // lane, lane))
        out2d = _run_gelu_2d(x2d)
        return jnp.reshape(out2d, orig_shape)

    # Ragged fallback (element count not a multiple of 128): pad only the tail.
    lane = 128
    rows = pl.cdiv(total, lane)
    padded_total = rows * lane
    x_flat = jnp.pad(jnp.reshape(x, (total,)), (0, padded_total - total))
    out2d = _run_gelu_2d(jnp.reshape(x_flat, (rows, lane)))
    out_flat = jnp.reshape(out2d, (padded_total,))[:total]
    return jnp.reshape(out_flat, orig_shape)


if __name__ == "__main__":
    key = jax.random.PRNGKey(0)
    k0, k1 = jax.random.split(key)

    # Small NCHW input consistent with the module's forward: (N=2, C=4, H=16, W=16)
    x = jax.random.normal(k0, (2, 4, 16, 16), dtype=jnp.float32)
    y = jax.block_until_ready(gelu_pallas(x))
    y_ref = jax.nn.gelu(x, approximate=False)
    assert jnp.allclose(y, y_ref, atol=1e-6, rtol=1e-6), "mismatch vs reference"

    # Ragged-size sanity check (element count not a multiple of 128).
    x2 = jax.random.normal(k1, (3, 5, 7, 11), dtype=jnp.float32)
    y2 = jax.block_until_ready(gelu_pallas(x2))
    y2_ref = jax.nn.gelu(x2, approximate=False)
    assert jnp.allclose(y2, y2_ref, atol=1e-6, rtol=1e-6), "mismatch vs reference (ragged)"

    print("KERNEL_OK")
</pallas_src>

<mosaic_0001>
module attributes {stable_mosaic.version = 11 : i64} {
  func.func @_gelu_kernel(%arg0: i32, %arg1: memref<1x2048xf32, #tpu.memory_space<vmem>>, %arg2: memref<1x2048xf32, #tpu.memory_space<vmem>>) attributes {dimension_semantics = [#tpu.dimension_semantics<parallel>], iteration_bounds = array<i64: 1>, scalar_prefetch = 0 : i64, scratch_operands = 0 : i64, tpu.core_type = #tpu.core_type<tc>, window_params = [{transform_indices = @transform_0, window_bounds = array<i64: 1, 2048>}, {transform_indices = @transform_1, window_bounds = array<i64: 1, 2048>}]} {
    %c0 = arith.constant 0 : index
    %c0_0 = arith.constant 0 : index
    %0 = vector.load %arg1[%c0, %c0_0] : memref<1x2048xf32, #tpu.memory_space<vmem>>, vector<1x2048xf32>
    %cst = arith.constant 5.000000e-01 : f32
    %1 = vector.broadcast %cst : f32 to vector<1x2048xf32>
    %2 = arith.mulf %1, %0 : vector<1x2048xf32>
    %cst_1 = arith.constant 0.707106769 : f32
    %3 = vector.broadcast %cst_1 : f32 to vector<1x2048xf32>
    %4 = arith.mulf %0, %3 : vector<1x2048xf32>
    %5 = math.erf %4 : vector<1x2048xf32>
    %cst_2 = arith.constant 1.000000e+00 : f32
    %6 = vector.broadcast %cst_2 : f32 to vector<1x2048xf32>
    %7 = arith.addf %6, %5 : vector<1x2048xf32>
    %8 = arith.mulf %2, %7 : vector<1x2048xf32>
    %c0_3 = arith.constant 0 : index
    %c0_4 = arith.constant 0 : index
    %9 = vector.load %arg2[%c0_3, %c0_4] : memref<1x2048xf32, #tpu.memory_space<vmem>>, vector<1x2048xf32>
    tpu.vector_store %arg2[%c0_3, %c0_4], %8 {strides = array<i32>} : memref<1x2048xf32, #tpu.memory_space<vmem>>, vector<1x2048xf32>,
    return
  }
  func.func @transform_0(%arg0: i32) -> (i32, i32) {
    %c0_i32 = arith.constant 0 : i32
    %c0_i32_0 = arith.constant 0 : i32
    return %arg0, %c0_i32 : i32, i32
  }
  func.func @transform_1(%arg0: i32) -> (i32, i32) {
    %c0_i32 = arith.constant 0 : i32
    %c0_i32_0 = arith.constant 0 : i32
    return %arg0, %c0_i32 : i32, i32
  }
}

</mosaic_0001>

<bundles_post_ra>
// kernel: tpu_custom_call.1
= control target key start
LH: loop header
LB: loop body
LE: loop exit
PB: predicated region body
PF: predicated region fallthrough
CT: control target
= control target key end

     0   :  { %6 = vsyncpa [#allocation3], 0  ;;  %s140_s0 = inlined_call_operand.hbm [shape: f32[1,2048], index: 0, kind: input, shape index: {}]   ;;  %s141_s1 = inlined_call_operand.hbm [shape: f32[1,2048], index: 1, kind: output, shape index: {}]  }
   0x1   :  { %7 = vsyncpa [#allocation4], 0  ;;  %s104_s6 = smov [#allocation2]   ;;  %s56_s10 = scalar_lea.hbm %s140_s0, 256 }
   0x2   :  { %s14_s7 = sshll.u32 %s104_s6, 4  ;;  %p57_p0 = scmp.ne.s32.totalorder %s140_s0, %s56_s10  ;;  %s15_s7 = int_to_ptr.vmem [resolvable:$true] %s14_s7 }
   0x3   :  { %p60_p1 = scmp.lt.u32.totalorder %s56_s10, %s140_s0 }
   0x5   :  { %p62_p2 = pnand %p60_p1, %p57_p0 }
   0x7   :  { %65 = shalt.err (!%p62_p2)
}
   0x8   :  { %s66_s15 = scalar_lea.vmem %s15_s7, 256  ;;  %p71_p4 = scmp.lt.s32.totalorder %s15_s7, %s15_s7 }
   0x9   :  { %p67_p3 = scmp.ne.s32.totalorder %s15_s7, %s66_s15  ;;  %p72_p5 = scmp.lt.s32.totalorder %s66_s15, %s66_s15 }
   0xb   :  { %p73_p6 = por %p72_p5, %p71_p4 }
   0xd   :  { %p74_p7 = pnand %p73_p6, %p67_p3 }
   0xf   :  { %77 = shalt.err (!%p74_p7)
}
  0x10   :  { %17 = dma.hbm_to_vmem [thread:$0]  %s140_s0, 256, %s15_s7, [#allocation3]  }
  0x11   :  { %100 = dma.done.wait [#allocation3], 256  }
  0x12   :  { %101 = vsyncadd [#allocation3], 4294967040  ;;  %v21_v0 = vld [vmem:[#allocation2] sm:$0xff]  ;;  %v22_v1 = vld [vmem:[#allocation2 + $0x8] sm:$0xff]  ;;  %s105_s18 = smov [#allocation5]  }
  0x13   :  { %v25_v2 = vmul.f32 0.70710677, %v21_v0  ;;  %v26_v3 = vmul.f32 0.70710677, %v22_v1  ;;  %v23_v4 = vmul.f32 0.5, %v21_v0  ;;  %v24_v6 = vmul.f32 0.5, %v22_v1 }
  0x14   :  { %s41_s19 = sshll.u32 %s105_s18, 4  ;;  %s42_s19 = int_to_ptr.vmem [resolvable:$true] %s41_s19 }
  0x15   :  { %52 = verf.f32 %v25_v2  ;;  %s78_s0 = scalar_lea.vmem %s42_s19, 256  ;;  %p83_p9 = scmp.lt.s32.totalorder %s42_s19, %s42_s19 }
  0x16   :  { %54 = verf.f32 %v26_v3  ;;  %p79_p8 = scmp.ne.s32.totalorder %s42_s19, %s78_s0  ;;  %p84_p10 = scmp.lt.s32.totalorder %s78_s0, %s78_s0 }
  0x18   :  { %p85_p11 = por %p84_p10, %p83_p9 }
  0x1a   :  { %p86_p12 = pnand %p85_p11, %p79_p8 }
  0x1f   :  { %v53_v5 = vpop.eup %52 }
  0x20   :  { %v55_v7 = vpop.eup %54  ;;  %v29_v8 = vadd.f32 1.0, %v53_v5 }
  0x21   :  { %v30_v9 = vadd.f32 1.0, %v55_v7 }
  0x22   :  { %v31_v10 = vmul.f32 %v29_v8, %v23_v4 }
  0x23   :  { %v32_v11 = vmul.f32 %v30_v9, %v24_v6 }
  0x24   :  { %33 = vst [vmem:[#allocation5] sm:$0xff] %v31_v10 }
  0x25   :  { %34 = vst [vmem:[#allocation5 + $0x8] sm:$0xff] %v32_v11 }
  0x26   :  { %89 = shalt.err (!%p86_p12)
}
  0x27   :  { %s90_s22 = scalar_lea.hbm %s141_s1, 256 }
  0x28   :  { %p91_p13 = scmp.ne.s32.totalorder %s141_s1, %s90_s22  ;;  %p94_p0 = scmp.lt.u32.totalorder %s90_s22, %s141_s1 }
  0x2a   :  { %p96_p1 = pnand %p94_p0, %p91_p13 }
  0x2c   :  { %99 = shalt.err (!%p96_p1)
}
  0x2d   :  { %44 = dma.vmem_to_hbm [thread:$0]  %s42_s19, 256, %s141_s1, [#allocation4]  }
  0x2e   :  { %102 = dma.done.wait [#allocation4], 256  }
  0x2f   :  { %103 = vsyncadd [#allocation4], 4294967040 }
  0x30   :  { %48 = vsyncpa [#allocation3], 1 }
  0x31   :  { %49 = vsyncpa [#allocation4], 1 }

</bundles_post_ra>
